<compile_context>
chip_gen: v6e
topology: v6e:2x2x1
jax: 0.10.0
libtpu: 0.0.40
codegen_flags: <defaults>
</compile_context>

<pallas_src>
import math

import jax
import jax.numpy as jnp
from jax.experimental import pallas as pl
from jax.experimental.pallas import tpu as pltpu


def _round_up(x, m):
    return ((x + m - 1) // m) * m


def _tensorcores_per_chip():
    """2 TensorCores only on megacore parts (v4 megacore, v7x); 1 on v5e/v6e."""
    try:
        kind = jax.devices()[0].device_kind.lower()
    except Exception:
        return 1
    return 2 if ("v7" in kind or "v4" in kind) else 1


def _make_kl_kernel(*, rows, tr, steps_per_core, two_axis, need_mask):
    def kernel(pm_ref, pls_ref, fm_ref, fls_ref, acc_ref):
        if two_axis:
            c = pl.program_id(0)
            s = pl.program_id(1)          # reduction ("arbitrary") axis
        else:
            c = 0
            s = pl.program_id(0)

        @pl.when(s == 0)
        def _init():
            acc_ref[...] = jnp.zeros_like(acc_ref)

        pm = pm_ref[...].astype(jnp.float32)
        pls = pls_ref[...].astype(jnp.float32)
        fm = fm_ref[...].astype(jnp.float32)
        fls = fls_ref[...].astype(jnp.float32)

        var_f = jnp.exp(2.0 * fls)
        inv_var_p = jnp.exp(-2.0 * pls)    # replaces the divide by 2*var_p
        diff = fm - pm
        kl = pls - fls - 0.5 + 0.5 * (var_f + diff * diff) * inv_var_p

        if need_mask:
            # Mask rows beyond the real array extent (partial / clamped-duplicate
            # blocks read unspecified data; jnp.where selects 0 regardless).
            blk = c * steps_per_core + s   # unclamped block index
            row0 = blk * tr
            row_ids = row0 + jax.lax.broadcasted_iota(jnp.int32, kl.shape, 0)
            kl = jnp.where(row_ids < rows, kl, 0.0)

        c_width = kl.shape[-1]
        # Fold tr rows into the (8, C) accumulator: tile-aligned reshape + vector adds.
        acc_ref[...] += jnp.sum(kl.reshape(tr // 8, 8, c_width), axis=0)

    return kernel


def probabilistic_loss(present_mu, present_log_sigma, future_mu, future_log_sigma,
                       loss_weight=1.0, *, row_tile=1024, small_size_threshold=8192,
                       num_cores=None):
    """KL(present || future)-style loss matching ProbabilisticLoss.forward.

    loss = mean_over_leading_dims( sum_over_last_dim(kl) ) * loss_weight, in float32.
    """
    assert (present_mu.shape == present_log_sigma.shape
            == future_mu.shape == future_log_sigma.shape)

    shape = present_mu.shape
    total = present_mu.size
    n_rows_mean = max(1, math.prod(shape[:-1])) if len(shape) > 0 else 1

    # Tiny inputs: launch overhead dwarfs the arithmetic; let XLA fuse it.
    if total <= small_size_threshold:
        return probabilistic_loss_ref(
            present_mu.astype(jnp.float32), present_log_sigma.astype(jnp.float32),
            future_mu.astype(jnp.float32), future_log_sigma.astype(jnp.float32),
            loss_weight)

    if num_cores is None:
        num_cores = _tensorcores_per_chip()

    # ---- layout: lane-dense [rows, C] view, always a free (contiguous) reshape ----
    D = shape[-1]
    C = None
    for cand in (512, 256, 128):
        if total % cand == 0:
            C = cand
            break
    if C is None:
        C = D                       # keep natural last dim (may be narrow, still valid)
    rows = total // C

    def prep(x):
        return x.reshape(rows, C)   # contiguous reshape: no copy, no pad

    # ---- tiling ----
    lanes = max(C, 128)             # VMEM lane padding for narrow last dims
    tr_cap = max(16, ((2 * 1024 * 1024) // (lanes * 4)) // 16 * 16)  # <=2 MiB f32/block
    tr = max(16, min(row_tile, tr_cap, _round_up(rows, 16)))

    rows_blocks = pl.cdiv(rows, tr)
    num_cores = max(1, min(num_cores, rows_blocks))
    steps_per_core = pl.cdiv(rows_blocks, num_cores)
    need_mask = (num_cores * steps_per_core * tr) != rows
    last_block = rows_blocks - 1

    if num_cores == 1:
        grid = (steps_per_core,)
        in_map = lambda s: (s, 0)
        out_map = lambda s: (0, 0)
        semantics = ("arbitrary",)
        two_axis = False
    else:
        grid = (num_cores, steps_per_core)

        def in_map(c, s):
            # Clamp so a fully out-of-bounds block (odd block count split over 2 cores)
            # re-reads the last valid block; its rows are fully masked in-kernel.
            return (jnp.minimum(c * steps_per_core + s, last_block), 0)

        out_map = lambda c, s: (c, 0)
        semantics = ("parallel", "arbitrary")
        two_axis = True

    kernel = _make_kl_kernel(rows=rows, tr=tr, steps_per_core=steps_per_core,
                             two_axis=two_axis, need_mask=need_mask)

    in_spec = pl.BlockSpec((tr, C), in_map)
    out_spec = pl.BlockSpec((8, C), out_map)     # (8, C): clean sublane-tiled block

    elem_bytes = jnp.dtype(present_mu.dtype).itemsize
    cost = pl.CostEstimate(
        flops=12 * total,
        transcendentals=2 * total,
        bytes_accessed=4 * total * elem_bytes + num_cores * 8 * C * 4,
    )

    args = tuple(prep(x) for x in (present_mu, present_log_sigma,
                                   future_mu, future_log_sigma))

    partials = pl.pallas_call(
        kernel,
        out_shape=jax.ShapeDtypeStruct((num_cores * 8, C), jnp.float32),
        grid_spec=pltpu.PrefetchScalarGridSpec(
            num_scalar_prefetch=0,
            grid=grid,
            in_specs=[in_spec] * 4,
            out_specs=out_spec,
        ),
        compiler_params=pltpu.CompilerParams(
            dimension_semantics=semantics,
            # 4 inputs x 2 buffers x <=2 MiB = <=16 MiB of block buffers; 32 MiB is safe
            # on v5e/v6e (128 MiB VMEM) and v7x (64 MiB physical / 32 MiB scoped).
            vmem_limit_bytes=32 * 1024 * 1024,
        ),
        cost_estimate=cost,
    )(*args)

    total_sum = jnp.sum(partials, dtype=jnp.float32)  # final sublane + lane + core reduce
    return total_sum / jnp.float32(n_rows_mean) * jnp.float32(loss_weight)


def probabilistic_loss_ref(present_mu, present_log_sigma, future_mu, future_log_sigma,
                           loss_weight=1.0):
    """Pure-JAX reference (mirrors the PyTorch forward)."""
    var_f = jnp.exp(2.0 * future_log_sigma)
    var_p = jnp.exp(2.0 * present_log_sigma)
    kl = (present_log_sigma - future_log_sigma - 0.5
          + (var_f + (future_mu - present_mu) ** 2) / (2.0 * var_p))
    return jnp.mean(jnp.sum(kl, axis=-1)) * loss_weight


if __name__ == "__main__":
    base_key = jax.random.PRNGKey(0)

    def run_case(idx, shape, dtype, rtol=1e-4, atol=1e-4):
        k = jax.random.fold_in(base_key, idx)
        k1, k2, k3, k4 = jax.random.split(k, 4)
        pm = jax.random.normal(k1, shape, dtype=jnp.float32).astype(dtype)
        pls = (0.1 * jax.random.normal(k2, shape, dtype=jnp.float32)).astype(dtype)
        fm = jax.random.normal(k3, shape, dtype=jnp.float32).astype(dtype)
        fls = (0.1 * jax.random.normal(k4, shape, dtype=jnp.float32)).astype(dtype)

        loss = probabilistic_loss(pm, pls, fm, fls, loss_weight=1.0)
        loss = jax.block_until_ready(loss)

        ref = probabilistic_loss_ref(
            pm.astype(jnp.float32), pls.astype(jnp.float32),
            fm.astype(jnp.float32), fls.astype(jnp.float32), 1.0)
        assert jnp.allclose(loss, ref, rtol=rtol, atol=atol), (shape, dtype, loss, ref)

    # ProbabilisticLoss has no parameters; inputs are the distribution tensors
    # produced upstream, shaped [B, S, latent_dim].
    run_case(0, (2, 8, 32), jnp.float32)      # tiny -> pure-jnp fast path
    run_case(1, (2, 300, 32), jnp.float32)    # kernel path: lane-dense C=256, masked tail
    run_case(2, (4, 256, 32), jnp.bfloat16)   # kernel path: C=512, bf16 streamed as-is
    run_case(3, (4, 4100, 32), jnp.float32)   # kernel path: multi-block accumulation / 2-core split

    print("KERNEL_OK")
</pallas_src>

<mosaic_0001>
module attributes {stable_mosaic.version = 11 : i64} {
  func.func @kernel(%arg0: i32, %arg1: memref<80x256xf32, #tpu.memory_space<vmem>>, %arg2: memref<80x256xf32, #tpu.memory_space<vmem>>, %arg3: memref<80x256xf32, #tpu.memory_space<vmem>>, %arg4: memref<80x256xf32, #tpu.memory_space<vmem>>, %arg5: memref<8x256xf32, #tpu.memory_space<vmem>>) attributes {dimension_semantics = [#tpu.dimension_semantics<arbitrary>], iteration_bounds = array<i64: 1>, scalar_prefetch = 0 : i64, scratch_operands = 0 : i64, tpu.core_type = #tpu.core_type<tc>, window_params = [{transform_indices = @transform_0, window_bounds = array<i64: 80, 256>}, {transform_indices = @transform_1, window_bounds = array<i64: 80, 256>}, {transform_indices = @transform_2, window_bounds = array<i64: 80, 256>}, {transform_indices = @transform_3, window_bounds = array<i64: 80, 256>}, {pipeline_mode = #tpu.pipeline_mode<synchronous>, transform_indices = @transform_4, window_bounds = array<i64: 8, 256>}]} {
    %c0_i32 = arith.constant 0 : i32
    %0 = arith.cmpi eq, %arg0, %c0_i32 : i32
    %1 = arith.extui %0 : i1 to i32
    %c0_i32_0 = arith.constant 0 : i32
    %2 = arith.cmpi ne, %1, %c0_i32_0 : i32
    scf.if %2 {
      %cst_18 = arith.constant 0.000000e+00 : f32
      %37 = vector.broadcast %cst_18 : f32 to vector<8x256xf32>
      %c0_19 = arith.constant 0 : index
      %c0_20 = arith.constant 0 : index
      %38 = vector.load %arg5[%c0_19, %c0_20] : memref<8x256xf32, #tpu.memory_space<vmem>>, vector<8x256xf32>
      tpu.vector_store %arg5[%c0_19, %c0_20], %37 {strides = array<i32>} : memref<8x256xf32, #tpu.memory_space<vmem>>, vector<8x256xf32>,
    } else {
    }
    %c0 = arith.constant 0 : index
    %c0_1 = arith.constant 0 : index
    %3 = vector.load %arg1[%c0, %c0_1] : memref<80x256xf32, #tpu.memory_space<vmem>>, vector<80x256xf32>
    %c0_2 = arith.constant 0 : index
    %c0_3 = arith.constant 0 : index
    %4 = vector.load %arg2[%c0_2, %c0_3] : memref<80x256xf32, #tpu.memory_space<vmem>>, vector<80x256xf32>
    %c0_4 = arith.constant 0 : index
    %c0_5 = arith.constant 0 : index
    %5 = vector.load %arg3[%c0_4, %c0_5] : memref<80x256xf32, #tpu.memory_space<vmem>>, vector<80x256xf32>
    %c0_6 = arith.constant 0 : index
    %c0_7 = arith.constant 0 : index
    %6 = vector.load %arg4[%c0_6, %c0_7] : memref<80x256xf32, #tpu.memory_space<vmem>>, vector<80x256xf32>
    %cst = arith.constant 2.000000e+00 : f32
    %7 = vector.broadcast %cst : f32 to vector<80x256xf32>
    %8 = arith.mulf %7, %6 : vector<80x256xf32>
    %9 = math.exp %8 : vector<80x256xf32>
    %cst_8 = arith.constant -2.000000e+00 : f32
    %10 = vector.broadcast %cst_8 : f32 to vector<80x256xf32>
    %11 = arith.mulf %10, %4 : vector<80x256xf32>
    %12 = math.exp %11 : vector<80x256xf32>
    %13 = arith.subf %5, %3 : vector<80x256xf32>
    %14 = arith.subf %4, %6 : vector<80x256xf32>
    %cst_9 = arith.constant 5.000000e-01 : f32
    %15 = vector.broadcast %cst_9 : f32 to vector<80x256xf32>
    %16 = arith.subf %14, %15 : vector<80x256xf32>
    %17 = arith.mulf %13, %13 : vector<80x256xf32>
    %18 = arith.addf %9, %17 : vector<80x256xf32>
    %cst_10 = arith.constant 5.000000e-01 : f32
    %19 = vector.broadcast %cst_10 : f32 to vector<80x256xf32>
    %20 = arith.mulf %19, %18 : vector<80x256xf32>
    %21 = arith.mulf %20, %12 : vector<80x256xf32>
    %22 = arith.addf %16, %21 : vector<80x256xf32>
    %c0_i32_11 = arith.constant 0 : i32
    %23 = arith.addi %c0_i32_11, %arg0 : i32
    %c80_i32 = arith.constant 80 : i32
    %24 = arith.muli %23, %c80_i32 : i32
    %25 = tpu.iota {dimensions = array<i32: 0>} : vector<80x256xi32>
    %26 = vector.broadcast %24 : i32 to vector<80x256xi32>
    %27 = arith.addi %26, %25 : vector<80x256xi32>
    %c75_i32 = arith.constant 75 : i32
    %28 = vector.broadcast %c75_i32 : i32 to vector<80x256xi32>
    %29 = arith.cmpi slt, %27, %28 : vector<80x256xi32>
    %cst_12 = arith.constant 0.000000e+00 : f32
    %30 = vector.broadcast %cst_12 : f32 to vector<80x256xf32>
    %31 = arith.select %29, %22, %30 : vector<80x256xi1>, vector<80x256xf32>
    %c0_13 = arith.constant 0 : index
    %c0_14 = arith.constant 0 : index
    %32 = vector.load %arg5[%c0_13, %c0_14] : memref<8x256xf32, #tpu.memory_space<vmem>>, vector<8x256xf32>
    %33 = vector.shape_cast %31 : vector<80x256xf32> to vector<10x8x256xf32>
    %cst_15 = arith.constant dense<0.000000e+00> : vector<8x256xf32>
    %34 = vector.multi_reduction <add>, %33, %cst_15 [0] : vector<10x8x256xf32> to vector<8x256xf32>
    %35 = arith.addf %32, %34 : vector<8x256xf32>
    %c0_16 = arith.constant 0 : index
    %c0_17 = arith.constant 0 : index
    %36 = vector.load %arg5[%c0_16, %c0_17] : memref<8x256xf32, #tpu.memory_space<vmem>>, vector<8x256xf32>
    tpu.vector_store %arg5[%c0_16, %c0_17], %35 {strides = array<i32>} : memref<8x256xf32, #tpu.memory_space<vmem>>, vector<8x256xf32>,
    return
  }
  func.func @transform_0(%arg0: i32) -> (i32, i32) {
    %c0_i32 = arith.constant 0 : i32
    %c0_i32_0 = arith.constant 0 : i32
    return %arg0, %c0_i32 : i32, i32
  }
  func.func @transform_1(%arg0: i32) -> (i32, i32) {
    %c0_i32 = arith.constant 0 : i32
    %c0_i32_0 = arith.constant 0 : i32
    return %arg0, %c0_i32 : i32, i32
  }
  func.func @transform_2(%arg0: i32) -> (i32, i32) {
    %c0_i32 = arith.constant 0 : i32
    %c0_i32_0 = arith.constant 0 : i32
    return %arg0, %c0_i32 : i32, i32
  }
  func.func @transform_3(%arg0: i32) -> (i32, i32) {
    %c0_i32 = arith.constant 0 : i32
    %c0_i32_0 = arith.constant 0 : i32
    return %arg0, %c0_i32 : i32, i32
  }
  func.func @transform_4(%arg0: i32) -> (i32, i32) {
    %c0_i32 = arith.constant 0 : i32
    %c0_i32_0 = arith.constant 0 : i32
    %c0_i32_1 = arith.constant 0 : i32
    return %c0_i32, %c0_i32_0 : i32, i32
  }
}

</mosaic_0001>

<bundles_post_ra>
// kernel: tpu_custom_call.1
= control target key start
LH: loop header
LB: loop body
LE: loop exit
PB: predicated region body
PF: predicated region fallthrough
CT: control target
= control target key end

     0   :  { %9 = vsyncpa [#allocation3], 0  ;;  %s1240_s0 = inlined_call_operand.hbm [shape: f32[75,256], index: 0, kind: input, shape index: {}]   ;;  %s1241_s1 = inlined_call_operand.hbm [shape: f32[75,256], index: 1, kind: input, shape index: {}]   ;;  %s1242_s2 = inlined_call_operand.hbm [shape: f32[75,256], index: 2, kind: input, shape index: {}]   ;;  %s1243_s3 = inlined_call_operand.hbm [shape: f32[75,256], index: 3, kind: input, shape index: {}]   ;;  %s1244_s4 = inlined_call_operand.hbm [shape: f32[8,256], index: 4, kind: output, shape index: {}]  }
   0x1   :  { %10 = vsyncpa [#allocation6], 0 }
   0x2   :  { %11 = vsyncpa [#allocation9], 0 }
   0x3   :  { %12 = vsyncpa [#allocation4], 0  ;;  %s749_s15 = smov [#allocation5]   ;;  %s750_s17 = smov [#allocation2]  }
   0x4   :  { %s30_s16 = sshll.u32 %s749_s15, 4  ;;  %s18_s18 = sshll.u32 %s750_s17, 4  ;;  %s31_s16 = int_to_ptr.vmem [resolvable:$true] %s30_s16  ;;  %s19_s18 = int_to_ptr.vmem [resolvable:$true] %s18_s18 }
   0x5   :  { %s649_s19 = scalar_lea.vmem %s31_s16, 2560  ;;  %p654_p1 = scmp.lt.s32.totalorder %s31_s16, %s31_s16 }
   0x6   :  { %p650_p0 = scmp.ne.s32.totalorder %s31_s16, %s649_s19  ;;  %p655_p2 = scmp.lt.s32.totalorder %s649_s19, %s649_s19 }
   0x8   :  { %p656_p3 = por %p655_p2, %p654_p1 }
   0xa   :  { %p657_p4 = pnand %p656_p3, %p650_p0 }
   0xc   :  { %660 = shalt.err (!%p657_p4)
}
   0xd   :  { %s751_s20 = smov 256   ;;  %s752_s21 = smov 16  }
   0xe   :  { %36 = dma.hbm_to_vmem [thread:$0]  %s1241_s1, 2560, %s31_s16, [#allocation6], %s751_s20, %s751_s20, %s752_s21  }
   0xf   :  { %s669_s24 = scalar_lea.vmem %s19_s18, 2560  ;;  %p674_p6 = scmp.lt.s32.totalorder %s19_s18, %s19_s18 }
  0x10   :  { %p670_p5 = scmp.ne.s32.totalorder %s19_s18, %s669_s24  ;;  %p675_p7 = scmp.lt.s32.totalorder %s669_s24, %s669_s24 }
  0x12   :  { %p676_p8 = por %p675_p7, %p674_p6 }
  0x14   :  { %p677_p9 = pnand %p676_p8, %p670_p5 }
  0x16   :  { %680 = shalt.err (!%p677_p9)
}
  0x17   :  { %24 = dma.hbm_to_vmem [thread:$0]  %s1240_s0, 2560, %s19_s18, [#allocation3], %s751_s20, %s751_s20, %s752_s21  }
  0x18   :  { %s753_s27 = smov [#allocation7]   ;;  %s754_s29 = smov [#allocation8]  }
  0x19   :  { %s42_s28 = sshll.u32 %s753_s27, 4  ;;  %s54_s30 = sshll.u32 %s754_s29, 4  ;;  %s43_s28 = int_to_ptr.vmem [resolvable:$true] %s42_s28  ;;  %s55_s30 = int_to_ptr.vmem [resolvable:$true] %s54_s30 }
  0x1a   :  { %s689_s1 = scalar_lea.vmem %s43_s28, 2560  ;;  %p694_p11 = scmp.lt.s32.totalorder %s43_s28, %s43_s28 }
  0x1b   :  { %p690_p10 = scmp.ne.s32.totalorder %s43_s28, %s689_s1  ;;  %p695_p12 = scmp.lt.s32.totalorder %s689_s1, %s689_s1 }
  0x1d   :  { %p696_p13 = por %p695_p12, %p694_p11 }
  0x1f   :  { %p697_p0 = pnand %p696_p13, %p690_p10 }
  0x21   :  { %700 = shalt.err (!%p697_p0)
}
  0x22   :  { %48 = dma.hbm_to_vmem [thread:$0]  %s1242_s2, 2560, %s43_s28, [#allocation6], %s751_s20, %s751_s20, %s752_s21  }
  0x23   :  { %s709_s0 = scalar_lea.vmem %s55_s30, 2560  ;;  %p714_p2 = scmp.lt.s32.totalorder %s55_s30, %s55_s30 }
  0x24   :  { %p710_p1 = scmp.ne.s32.totalorder %s55_s30, %s709_s0  ;;  %p715_p3 = scmp.lt.s32.totalorder %s709_s0, %s709_s0 }
  0x26   :  { %p716_p4 = por %p715_p3, %p714_p2 }
  0x28   :  { %p717_p5 = pnand %p716_p4, %p710_p1 }
  0x2a   :  { %720 = shalt.err (!%p717_p5)
}
  0x2b   :  { %60 = dma.hbm_to_vmem [thread:$0]  %s1243_s3, 2560, %s55_s30, [#allocation9], %s751_s20, %s751_s20, %s752_s21  }
  0x2c   :  { %741 = dma.done.wait [#allocation3], 2560  }
  0x2d   :  { %742 = vsyncadd [#allocation3], 4294964736 }
  0x2e   :  { %743 = dma.done.wait [#allocation6], 5120  }
  0x2f   :  { %744 = vsyncadd [#allocation6], 4294962176 }
  0x30   :  { %745 = dma.done.wait [#allocation9], 2560  }
  0x31   :  { %746 = vsyncadd [#allocation9], 4294964736  ;;  %v440_v0 = vlaneseq  ;;  %v805_v1 = vld [vmem:[#allocation5] sm:$0xff]  ;;  %v807_v2 = vld [vmem:[#allocation5 + $0x8] sm:$0xff]  ;;  %s755_s2 = smov [#allocation10]  }
  0x32   :  { %v809_v4 = vld [vmem:[#allocation5 + $0x10] sm:$0xff]  ;;  %v811_v5 = vld [vmem:[#allocation5 + $0x18] sm:$0xff]  ;;  %v813_v6 = vld [vmem:[#allocation5 + $0x20] sm:$0xff]  ;;  %v219_v16 = vmul.f32 -2.0, %v805_v1  ;;  %v220_v17 = vmul.f32 -2.0, %v807_v2  ;;  %s522_s3 = sshll.u32 %s755_s2, 4  ;;  %s523_s3 = int_to_ptr.vmem [resolvable:$true] %s522_s3 }
  0x33   :  { %v441_v3 = vshrl.u32 %v440_v0, 7  ;;  %v815_v7 = vld [vmem:[#allocation5 + $0x28] sm:$0xff]  ;;  %v817_v8 = vld [vmem:[#allocation5 + $0x30] sm:$0xff]  ;;  %v819_v9 = vld [vmem:[#allocation5 + $0x38] sm:$0xff]  ;;  %v221_v20 = vmul.f32 -2.0, %v809_v4  ;;  %v222_v21 = vmul.f32 -2.0, %v811_v5  ;;  %p726_p7 = scmp.lt.s32.totalorder %s523_s3, %s523_s3 }
  0x34   :  { %1270 = vst [vmem:[#allocation15_spill] sm:$0xff] %v819_v9  ;;  %v821_v10 = vld [vmem:[#allocation5 + $0x40] sm:$0xff]  ;;  %v823_v11 = vld [vmem:[#allocation5 + $0x48] sm:$0xff]  ;;  %v825_v12 = vld [vmem:[#allocation5 + $0x50] sm:$0xff]  ;;  %v223_v22 = vmul.f32 -2.0, %v813_v6  ;;  %v224_v23 = vmul.f32 -2.0, %v815_v7 }
  0x35   :  { %1271 = vst [vmem:[#allocation16_spill] sm:$0xff] %v821_v10  ;;  %1272 = vst [vmem:[#allocation17_spill] sm:$0xff] %v823_v11  ;;  %v827_v13 = vld [vmem:[#allocation5 + $0x58] sm:$0xff]  ;;  %v829_v14 = vld [vmem:[#allocation5 + $0x60] sm:$0xff]  ;;  %v835_v18 = vadd.s32 72, %v441_v3  ;;  %v848_v28 = vmul.f32 -2.0, %v817_v8 }
  0x36   :  { %1273 = vst [vmem:[#allocation18_spill] sm:$0xff] %v825_v12  ;;  %1274 = vst [vmem:[#allocation19_spill] sm:$0xff] %v827_v13  ;;  %v831_v15 = vld [vmem:[#allocation5 + $0x68] sm:$0xff]  ;;  %v837_v19 = vld [vmem:[#allocation5 + $0x70] sm:$0xff]  ;;  %v851_v29 = vmul.f32 -2.0, %v819_v9  ;;  %v854_v30 = vmul.f32 -2.0, %v821_v10 }
  0x37   :  { %1275 = vst [vmem:[#allocation20_spill] sm:$0xff] %v829_v14  ;;  %1276 = vst [vmem:[#allocation21_spill] sm:$0xff] %v831_v15  ;;  %v79_v24 = vld [vmem:[#allocation2] sm:$0xff]  ;;  %v80_v25 = vld [vmem:[#allocation2 + $0x8] sm:$0xff]  ;;  %v857_v31 = vmul.f32 -2.0, %v823_v11  ;;  %v864_v36 = vmul.f32 -2.0, %v825_v12 }
  0x38   :  { %1277 = vst [vmem:[#allocation22_spill] sm:$0xff] %v835_v18  ;;  %1278 = vst [vmem:[#allocation23_spill] sm:$0xff] %v837_v19  ;;  %v843_v26 = vld [vmem:[#allocation5 + $0x78] sm:$0xff]  ;;  %v845_v27 = vld [vmem:[#allocation5 + $0x80] sm:$0xff]  ;;  %v867_v37 = vmul.f32 -2.0, %v827_v13  ;;  %v870_v38 = vmul.f32 -2.0, %v829_v14 }
  0x39   :  { %1279 = vst [vmem:[#allocation24_spill] sm:$0xff] %v843_v26  ;;  %1280 = vst [vmem:[#allocation25_spill] sm:$0xff] %v845_v27  ;;  %v81_v32 = vld [vmem:[#allocation2 + $0x10] sm:$0xff]  ;;  %v82_v33 = vld [vmem:[#allocation2 + $0x18] sm:$0xff]  ;;  %v873_v39 = vmul.f32 -2.0, %v831_v15  ;;  %v878_v45 = vmul.f32 -2.0, %v837_v19 }
  0x3a   :  { %v859_v34 = vld [vmem:[#allocation5 + $0x88] sm:$0xff]  ;;  %v861_v35 = vld [vmem:[#allocation5 + $0x90] sm:$0xff]  ;;  %v83_v40 = vld [vmem:[#allocation2 + $0x20] sm:$0xff]  ;;  %v239_v46 = vmul.f32 1.442695, %v219_v16  ;;  %v881_v52 = vmul.f32 -2.0, %v843_v26 }
  0x3b   :  { %1281 = vst [vmem:[#allocation26_spill] sm:$0xff] %v859_v34  ;;  %1282 = vst [vmem:[#allocation27_spill] sm:$0xff] %v861_v35  ;;  %v84_v41 = vld [vmem:[#allocation2 + $0x28] sm:$0xff]  ;;  %v875_v42 = vld [vmem:[#allocation5 + $0x98] sm:$0xff]  ;;  %v884_v53 = vmul.f32 -2.0, %v845_v27  ;;  %v887_v58 = vmul.f32 -2.0, %v859_v34 }
  0x3c   :  { %1283 = vst [vmem:[#allocation28_spill] sm:$0xff] %v875_v42  ;;  %v119_v43 = vld [vmem:[#allocation7] sm:$0xff]  ;;  %v120_v44 = vld [vmem:[#allocation7 + $0x8] sm:$0xff]  ;;  %v85_v47 = vld [vmem:[#allocation2 + $0x30] sm:$0xff]  ;;  %v241_v54 = vmul.f32 1.442695, %v220_v17  ;;  %561 = vpow2.f32 %v239_v46 }
  0x3d   :  { %v86_v48 = vld [vmem:[#allocation2 + $0x38] sm:$0xff]  ;;  %v87_v49 = vld [vmem:[#allocation2 + $0x40] sm:$0xff]  ;;  %v121_v50 = vld [vmem:[#allocation7 + $0x10] sm:$0xff]  ;;  %v890_v59 = vmul.f32 -2.0, %v861_v35  ;;  %v243_v60 = vmul.f32 1.442695, %v221_v20  ;;  %v895_v17 = vsub.f32 %v119_v43, %v79_v24  ;;  %v897_v27 = vsub.f32 %v120_v44, %v80_v25 }
  0x3e   :  { %v122_v51 = vld [vmem:[#allocation7 + $0x18] sm:$0xff]  ;;  %v88_v55 = vld [vmem:[#allocation2 + $0x48] sm:$0xff]  ;;  %v123_v56 = vld [vmem:[#allocation7 + $0x20] sm:$0xff]  ;;  %v893_v16 = vmul.f32 -2.0, %v875_v42  ;;  %v245_v18 = vmul.f32 1.442695, %v222_v21  ;;  %v901_v14 = vsub.f32 %v121_v50, %v81_v32  ;;  %563 = vpow2.f32 %v241_v54 }
  0x3f   :  { %v124_v57 = vld [vmem:[#allocation7 + $0x28] sm:$0xff]  ;;  %v89_v61 = vld [vmem:[#allocation2 + $0x50] sm:$0xff]  ;;  %v90_v62 = vld [vmem:[#allocation2 + $0x58] sm:$0xff]  ;;  %1284 = vst [vmem:[#allocation29_spill] sm:$0xff] %v895_v17  ;;  %v247_v20 = vmul.f32 1.442695, %v223_v22  ;;  %v903_v13 = vsub.f32 %v122_v51, %v82_v33  ;;  %v907_v24 = vsub.f32 %v123_v56, %v83_v40  ;;  %565 = vpow2.f32 %v243_v60 }
  0x40   :  { %v125_v63 = vld [vmem:[#allocation7 + $0x30] sm:$0xff]  ;;  %v126_v0 = vld [vmem:[#allocation7 + $0x38] sm:$0xff]  ;;  %v127_v3 = vld [vmem:[#allocation7 + $0x40] sm:$0xff]  ;;  %1285 = vst [vmem:[#allocation30_spill] sm:$0xff] %v897_v27  ;;  %v249_v21 = vmul.f32 1.442695, %v224_v23  ;;  %v909_v25 = vsub.f32 %v124_v57, %v84_v41  ;;  %567 = vpow2.f32 %v245_v18 }
  0x41   :  { %v91_v26 = vld [vmem:[#allocation2 + $0x60] sm:$0xff]  ;;  %v92_v34 = vld [vmem:[#allocation2 + $0x68] sm:$0xff]  ;;  %v129_v15 = vld [vmem:[#allocation7 + $0x50] sm:$0xff]  ;;  %1286 = vst [vmem:[#allocation31_spill] sm:$0xff] %v901_v14  ;;  %v915_v22 = vsub.f32 %v125_v63, %v85_v47  ;;  %v917_v32 = vsub.f32 %v126_v0, %v86_v48  ;;  %v919_v33 = vsub.f32 %v127_v3, %v87_v49  ;;  %v251_v54 = vmul.f32 1.442695, %v848_v28 }
  0x42   :  { %v128_v19 = vld [vmem:[#allocation7 + $0x48] sm:$0xff]  ;;  %v899_v35 = vld [vmem:[#allocation8] sm:$0xff]  ;;  %1287 = vst [vmem:[#allocation32_spill] sm:$0xff] %v903_v13  ;;  %v130_v12 = vld [vmem:[#allocation7 + $0x58] sm:$0xff]  ;;  %569 = vpow2.f32 %v247_v20  ;;  %v934_v63 = vsub.f32 %v129_v15, %v89_v61  ;;  %s721_s9 = scalar_lea.vmem %s523_s3, 256 }
  0x43   :  { %v131_v42 = vld [vmem:[#allocation7 + $0x60] sm:$0xff]  ;;  %v905_v11 = vld [vmem:[#allocation8 + $0x8] sm:$0xff]  ;;  %1288 = vst [vmem:[#allocation33_spill] sm:$0xff] %v907_v24  ;;  %1289 = vst [vmem:[#allocation34_spill] sm:$0xff] %v909_v25  ;;  %v159_v41 = vmul.f32 2.0, %v899_v35  ;;  %v929_v56 = vsub.f32 %v128_v19, %v88_v55  ;;  %v936_v0 = vsub.f32 %v130_v12, %v90_v62  ;;  %571 = vpow2.f32 %v249_v21  ;;  %p722_p6 = scmp.ne.s32.totalorder %s523_s3, %s721_s9  ;;  %p727_p8 = scmp.lt.s32.totalorder %s721_s9, %s721_s9 }
  0x44   :  { %v93_v43 = vld [vmem:[#allocation2 + $0x70] sm:$0xff]  ;;  %v132_v44 = vld [vmem:[#allocation7 + $0x68] sm:$0xff]  ;;  %v913_v46 = vld [vmem:[#allocation8 + $0x18] sm:$0xff]  ;;  %1290 = vst [vmem:[#allocation35_spill] sm:$0xff] %v915_v22  ;;  %v160_v49 = vmul.f32 2.0, %v905_v11  ;;  %v943_v28 = vsub.f32 %v131_v42, %v91_v26  ;;  %573 = vpow2.f32 %v251_v54 }
  0x45   :  { %v911_v27 = vld [vmem:[#allocation8 + $0x10] sm:$0xff]  ;;  %1291 = vst [vmem:[#allocation36_spill] sm:$0xff] %v917_v32  ;;  %1292 = vst [vmem:[#allocation37_spill] sm:$0xff] %v919_v33  ;;  %v94_v50 = vld [vmem:[#allocation2 + $0x78] sm:$0xff]  ;;  %v945_v55 = vsub.f32 %v132_v44, %v92_v34  ;;  %v162_v12 = vmul.f32 2.0, %v913_v46  ;;  %p728_p9 = por %p727_p8, %p726_p7 }
  0x46   :  { %v921_v51 = vld [vmem:[#allocation8 + $0x20] sm:$0xff]  ;;  %v923_v23 = vld [vmem:[#allocation8 + $0x28] sm:$0xff]  ;;  %v925_v40 = vld [vmem:[#allocation8 + $0x30] sm:$0xff]  ;;  %1293 = vst [vmem:[#allocation38_spill] sm:$0xff] %v929_v56  ;;  %v161_v19 = vmul.f32 2.0, %v911_v27 }
  0x47   :  { %v95_v47 = vld [vmem:[#allocation2 + $0x80] sm:$0xff]  ;;  %v133_v57 = vld [vmem:[#allocation7 + $0x70] sm:$0xff]  ;;  %v134_v48 = vld [vmem:[#allocation7 + $0x78] sm:$0xff]  ;;  %1295 = vst [vmem:[#allocation40_spill] sm:$0xff] %v934_v63  ;;  %v163_v61 = vmul.f32 2.0, %v921_v51  ;;  %v164_v62 = vmul.f32 2.0, %v923_v23  ;;  %p729_p10 = pnand %p728_p9, %p722_p6 }
  0x48   :  { %v931_v60 = vld [vmem:[#allocation8 + $0x38] sm:$0xff]  ;;  %1296 = vst [vmem:[#allocation41_spill] sm:$0xff] %v936_v0  ;;  %v135_v3 = vld [vmem:[#allocation7 + $0x80] sm:$0xff]  ;;  %v940_v18 = vld [vmem:[#allocation8 + $0x48] sm:$0xff]  ;;  %v165_v20 = vmul.f32 2.0, %v925_v40  ;;  %v962_v44 = vsub.f32 %v133_v57, %v93_v43  ;;  %v968_v14 = vsub.f32 %v134_v48, %v94_v50 }
  0x49   :  { %1294 = vst [vmem:[#allocation39_spill] sm:$0xff] %v931_v60  ;;  %v938_v33 = vld [vmem:[#allocation8 + $0x40] sm:$0xff]  ;;  %1298 = vst [vmem:[#allocation43_spill] sm:$0xff] %v940_v18  ;;  %v96_v56 = vld [vmem:[#allocation2 + $0x88] sm:$0xff]  ;;  %v166_v42 = vmul.f32 2.0, %v931_v60  ;;  %v168_v24 = vmul.f32 2.0, %v940_v18  ;;  %v976_v57 = vsub.f32 %v135_v3, %v95_v47 }
  0x4a   :  { %1297 = vst [vmem:[#allocation42_spill] sm:$0xff] %v938_v33  ;;  %1299 = vst [vmem:[#allocation44_spill] sm:$0xff] %v943_v28  ;;  %v136_v32 = vld [vmem:[#allocation7 + $0x88] sm:$0xff]  ;;  %v947_v22 = vld [vmem:[#allocation8 + $0x50] sm:$0xff]  ;;  %v179_v21 = vmul.f32 1.442695, %v159_v41 }
  0x4b   :  { %1300 = vst [vmem:[#allocation45_spill] sm:$0xff] %v945_v55  ;;  %1301 = vst [vmem:[#allocation46_spill] sm:$0xff] %v947_v22  ;;  %v949_v15 = vld [vmem:[#allocation8 + $0x58] sm:$0xff]  ;;  %v955_v0 = vld [vmem:[#allocation8 + $0x60] sm:$0xff]  ;;  %v167_v25 = vmul.f32 2.0, %v938_v33  ;;  %v169_v41 = vmul.f32 2.0, %v947_v22 }
  0x4c   :  { %1302 = vst [vmem:[#allocation47_spill] sm:$0xff] %v949_v15  ;;  %1303 = vst [vmem:[#allocation48_spill] sm:$0xff] %v955_v0  ;;  %v957_v26 = vld [vmem:[#allocation8 + $0x68] sm:$0xff]  ;;  %v959_v34 = vld [vmem:[#allocation8 + $0x70] sm:$0xff]  ;;  %v181_v13 = vmul.f32 1.442695, %v160_v49  ;;  %575 = vpow2.f32 %v179_v21 }
  0x4d   :  { %1304 = vst [vmem:[#allocation49_spill] sm:$0xff] %v957_v26  ;;  %1305 = vst [vmem:[#allocation50_spill] sm:$0xff] %v959_v34  ;;  %v97_v55 = vld [vmem:[#allocation2 + $0x90] sm:$0xff]  ;;  %v964_v63 = vld [vmem:[#allocation8 + $0x78] sm:$0xff]  ;;  %v170_v43 = vmul.f32 2.0, %v949_v15  ;;  %v171_v33 = vmul.f32 2.0, %v955_v0 }
  0x4e   :  { %1306 = vst [vmem:[#allocation51_spill] sm:$0xff] %v962_v44  ;;  %v137_v28 = vld [vmem:[#allocation7 + $0x90] sm:$0xff]  ;;  %1307 = vst [vmem:[#allocation52_spill] sm:$0xff] %v968_v14  ;;  %v970_v17 = vld [vmem:[#allocation8 + $0x80] sm:$0xff]  ;;  %v183_v54 = vmul.f32 1.442695, %v161_v19  ;;  %v986_v19 = vsub.f32 %v136_v32, %v96_v56  ;;  %577 = vpow2.f32 %v181_v13 }
  0x4f   :  { %v972_v10 = vld [vmem:[#allocation8 + $0x88] sm:$0xff]  ;;  %1308 = vst [vmem:[#allocation53_spill] sm:$0xff] %v976_v57  ;;  %v978_v44 = vld [vmem:[#allocation8 + $0x90] sm:$0xff]  ;;  %v172_v18 = vmul.f32 2.0, %v957_v26  ;;  %v173_v50 = vmul.f32 2.0, %v959_v34  ;;  %v98_v49 = vld [vmem:[#allocation2 + $0x98] sm:$0xff]  ;;  %v990_v26 = vpop.eup %561  ;;  %v993_v0 = vsub.f32 %v137_v28, %v97_v55 }
  0x50   :  { %1309 = vst [vmem:[#allocation54_spill] sm:$0xff] %v978_v44  ;;  %v185_v48 = vmul.f32 1.442695, %v162_v12  ;;  %v138_v14 = vld [vmem:[#allocation7 + $0x98] sm:$0xff]  ;;  %v174_v22 = vmul.f32 2.0, %v964_v63  ;;  %1311 = vst [vmem:[#allocation56_spill] sm:$0xff] %v986_v19  ;;  %579 = vpow2.f32 %v183_v54  ;;  %v995_v60 = vpop.eup %563 }
  0x51   :  { %v983_v9 = vld [vmem:[#allocation8 + $0x98] sm:$0xff]  ;;  %v187_v15 = vmul.f32 1.442695, %v163_v61  ;;  %v175_v47 = vmul.f32 2.0, %v970_v17  ;;  %v176_v3 = vmul.f32 2.0, %v972_v10  ;;  %1312 = vst [vmem:[#allocation57_spill] sm:$0xff] %v990_v26  ;;  %v998_v56 = vsub.f32 %v138_v14, %v98_v49  ;;  %v1000_v21 = vpop.eup %565 }
  0x52   :  { %1310 = vst [vmem:[#allocation55_spill] sm:$0xff] %v983_v9  ;;  %v189_v57 = vmul.f32 1.442695, %v164_v62  ;;  %v177_v12 = vmul.f32 2.0, %v978_v44  ;;  %v191_v34 = vmul.f32 1.442695, %v165_v20  ;;  %581 = vpow2.f32 %v185_v48  ;;  %v1002_v19 = vpop.eup %567 }
  0x53   :  { %1313 = vst [vmem:[#allocation58_spill] sm:$0xff] %v995_v60  ;;  %v178_v61 = vmul.f32 2.0, %v983_v9  ;;  %v193_v32 = vmul.f32 1.442695, %v166_v42  ;;  %583 = vpow2.f32 %v187_v15  ;;  %v195_v13 = vmul.f32 1.442695, %v167_v25  ;;  %v1004_v54 = vpop.eup %569 }
  0x54   :  { %v197_v62 = vmul.f32 1.442695, %v168_v24  ;;  %v199_v26 = vmul.f32 1.442695, %v169_v41  ;;  %585 = vpow2.f32 %v189_v57  ;;  %v201_v20 = vmul.f32 1.442695, %v170_v43  ;;  %v1006_v14 = vpop.eup %571 }
  0x55   :  { %v203_v28 = vmul.f32 1.442695, %v171_v33  ;;  %v205_v55 = vmul.f32 1.442695, %v172_v18  ;;  %587 = vpow2.f32 %v191_v34  ;;  %v207_v60 = vmul.f32 1.442695, %v173_v50  ;;  %v1013_v18 = vpop.eup %573 }
  0x56   :  { %v209_v48 = vmul.f32 1.442695, %v174_v22  ;;  %v211_v42 = vmul.f32 1.442695, %v175_v47  ;;  %589 = vpow2.f32 %v193_v32  ;;  %v213_v49 = vmul.f32 1.442695, %v176_v3 }
  0x57   :  { %v215_v15 = vmul.f32 1.442695, %v177_v12  ;;  %v217_v25 = vmul.f32 1.442695, %v178_v61  ;;  %591 = vpow2.f32 %v195_v13  ;;  %v253_v24 = vmul.f32 1.442695, %v851_v29 }
  0x58   :  { %v255_v41 = vmul.f32 1.442695, %v854_v30  ;;  %v1011_v33 = vmul.f32 1.442695, %v857_v31  ;;  %593 = vpow2.f32 %v197_v62  ;;  %v1016_v22 = vmul.f32 1.442695, %v864_v36 }
  0x59   :  { %v1019_v34 = vmul.f32 1.442695, %v867_v37  ;;  %v1022_v43 = vmul.f32 1.442695, %v870_v38  ;;  %595 = vpow2.f32 %v199_v26  ;;  %v1025_v29 = vmul.f32 1.442695, %v873_v39  ;;  %v1049_v26 = vpop.eup %575 }
  0x5a   :  { %v1028_v30 = vmul.f32 1.442695, %v878_v45  ;;  %v1031_v31 = vmul.f32 1.442695, %v881_v52  ;;  %597 = vpow2.f32 %v201_v20  ;;  %v1034_v36 = vmul.f32 1.442695, %v884_v53 }
  0x5b   :  { %v1037_v37 = vmul.f32 1.442695, %v887_v58  ;;  %v1040_v38 = vmul.f32 1.442695, %v890_v59  ;;  %599 = vpow2.f32 %v203_v28  ;;  %v1043_v39 = vmul.f32 1.442695, %v893_v16  ;;  %v1057_v16 = vpop.eup %577 }
  0x5c   :  { %v299_v45 = vsub.f32 %v805_v1, %v899_v35  ;;  %v300_v52 = vsub.f32 %v807_v2, %v905_v11  ;;  %601 = vpow2.f32 %v205_v55  ;;  %v301_v53 = vsub.f32 %v809_v4, %v911_v27  ;;  %v1314_v11 = vld [vmem:[#allocation39_spill] sm:$0xff]  ;;  %v1316_v4 = vld [vmem:[#allocation42_spill] sm:$0xff]  ;;  %v1325_v61 = vld [vmem:[#allocation20_spill] sm:$0xff] }
  0x5d   :  { %v302_v58 = vsub.f32 %v811_v5, %v913_v46  ;;  %v303_v59 = vsub.f32 %v813_v6, %v921_v51  ;;  %603 = vpow2.f32 %v207_v60  ;;  %v304_v1 = vsub.f32 %v815_v7, %v923_v23  ;;  %v1315_v35 = vld [vmem:[#allocation15_spill] sm:$0xff]  ;;  %v1065_v50 = vpop.eup %579  ;;  %v1317_v5 = vld [vmem:[#allocation16_spill] sm:$0xff]  ;;  %v1319_v6 = vld [vmem:[#allocation17_spill] sm:$0xff] }
  0x5e   :  { %v305_v2 = vsub.f32 %v817_v8, %v925_v40  ;;  %v306_v57 = vsub.f32 %v1315_v35, %v1314_v11  ;;  %605 = vpow2.f32 %v209_v48  ;;  %v307_v27 = vsub.f32 %v1317_v5, %v1316_v4  ;;  %v1318_v46 = vld [vmem:[#allocation43_spill] sm:$0xff]  ;;  %v1320_v47 = vld [vmem:[#allocation46_spill] sm:$0xff]  ;;  %v1324_v40 = vld [vmem:[#allocation48_spill] sm:$0xff] }
  0x5f   :  { %v308_v51 = vsub.f32 %v1319_v6, %v1318_v46  ;;  %v1321_v60 = vld [vmem:[#allocation18_spill] sm:$0xff]  ;;  %v1073_v12 = vpop.eup %581  ;;  %607 = vpow2.f32 %v211_v42  ;;  %v1322_v7 = vld [vmem:[#allocation47_spill] sm:$0xff]  ;;  %v311_v32 = vsub.f32 %v1325_v61, %v1324_v40  ;;  %v1326_v13 = vld [vmem:[#allocation49_spill] sm:$0xff]  ;;  %v1099_v61 = vadd.f32 -0.5, %v299_v45 }
  0x60   :  { %v309_v3 = vsub.f32 %v1321_v60, %v1320_v47  ;;  %v1323_v8 = vld [vmem:[#allocation19_spill] sm:$0xff]  ;;  %v1327_v62 = vld [vmem:[#allocation21_spill] sm:$0xff]  ;;  %v1081_v28 = vpop.eup %583  ;;  %609 = vpow2.f32 %v213_v49  ;;  %v1328_v55 = vld [vmem:[#allocation50_spill] sm:$0xff]  ;;  %v1119_v45 = vadd.f32 -0.5, %v307_v27 }
  0x61   :  { %v310_v23 = vsub.f32 %v1323_v8, %v1322_v7  ;;  %v312_v20 = vsub.f32 %v1327_v62, %v1326_v13  ;;  %v1329_v48 = vld [vmem:[#allocation23_spill] sm:$0xff]  ;;  %v1330_v35 = vld [vmem:[#allocation24_spill] sm:$0xff]  ;;  %v1331_v42 = vld [vmem:[#allocation25_spill] sm:$0xff]  ;;  %v1089_v46 = vpop.eup %585  ;;  %611 = vpow2.f32 %v215_v15  ;;  %v1107_v15 = vadd.f32 -0.5, %v302_v58 }
  0x62   :  { %v313_v11 = vsub.f32 %v1329_v48, %v1328_v55  ;;  %v314_v4 = vsub.f32 %v1330_v35, %v964_v63  ;;  %v315_v5 = vsub.f32 %v1331_v42, %v970_v17  ;;  %v1332_v6 = vld [vmem:[#allocation26_spill] sm:$0xff]  ;;  %v1097_v40 = vpop.eup %587  ;;  %613 = vpow2.f32 %v217_v25  ;;  %1337 = vst [vmem:[#allocation42_spill] sm:$0xff] %v1119_v45  ;;  %v1354_v7 = vld [vmem:[#allocation36_spill] sm:$0xff]  ;;  %v1363_v44 = vld [vmem:[#allocation53_spill] sm:$0xff] }
  0x63   :  { %v316_v47 = vsub.f32 %v1332_v6, %v972_v10  ;;  %v1101_v63 = vadd.f32 -0.5, %v300_v52  ;;  %v1103_v17 = vadd.f32 -0.5, %v301_v53  ;;  %v1105_v13 = vpop.eup %589  ;;  %615 = vpow2.f32 %v253_v24  ;;  %v1364_v60 = vld [vmem:[#allocation56_spill] sm:$0xff] }
  0x64   :  { %v1109_v10 = vadd.f32 -0.5, %v303_v59  ;;  %v1111_v62 = vadd.f32 -0.5, %v304_v1  ;;  %v1113_v55 = vpop.eup %591  ;;  %617 = vpow2.f32 %v255_v41  ;;  %v1115_v48 = vadd.f32 -0.5, %v305_v2 }
  0x65   :  { %v1117_v25 = vadd.f32 -0.5, %v306_v57  ;;  %v1121_v52 = vpop.eup %593  ;;  %619 = vpow2.f32 %v1011_v33  ;;  %v1124_v24 = vadd.f32 -0.5, %v308_v51  ;;  %v1126_v53 = vadd.f32 -0.5, %v309_v3 }
  0x66   :  { %1335 = vst [vmem:[#allocation39_spill] sm:$0xff] %v1115_v48  ;;  %v1128_v58 = vadd.f32 -0.5, %v310_v23  ;;  %v1130_v59 = vpop.eup %595  ;;  %621 = vpow2.f32 %v1016_v22  ;;  %v1133_v41 = vadd.f32 -0.5, %v311_v32  ;;  %v1135_v1 = vadd.f32 -0.5, %v312_v20  ;;  %v1347_v23 = vld [vmem:[#allocation29_spill] sm:$0xff]  ;;  %v1348_v32 = vld [vmem:[#allocation30_spill] sm:$0xff] }
  0x67   :  { %1336 = vst [vmem:[#allocation15_spill] sm:$0xff] %v1117_v25  ;;  %1338 = vst [vmem:[#allocation16_spill] sm:$0xff] %v1124_v24  ;;  %v1137_v2 = vadd.f32 -0.5, %v313_v11  ;;  %v598_v57 = vpop.eup %597  ;;  %623 = vpow2.f32 %v1019_v34  ;;  %v1140_v33 = vadd.f32 -0.5, %v314_v4  ;;  %v1142_v27 = vadd.f32 -0.5, %v315_v5  ;;  %v1349_v11 = vld [vmem:[#allocation31_spill] sm:$0xff] }
  0x68   :  { %1339 = vst [vmem:[#allocation43_spill] sm:$0xff] %v1126_v53  ;;  %1340 = vst [vmem:[#allocation17_spill] sm:$0xff] %v1128_v58  ;;  %v1144_v51 = vadd.f32 -0.5, %v316_v47  ;;  %v600_v3 = vpop.eup %599  ;;  %625 = vpow2.f32 %v1022_v43  ;;  %v339_v22 = vmul.f32 %v1347_v23, %v1347_v23  ;;  %v340_v20 = vmul.f32 %v1348_v32, %v1348_v32  ;;  %v1350_v34 = vld [vmem:[#allocation32_spill] sm:$0xff]  ;;  %v1351_v5 = vld [vmem:[#allocation33_spill] sm:$0xff] }
  0x69   :  { %1341 = vst [vmem:[#allocation46_spill] sm:$0xff] %v1133_v41  ;;  %1342 = vst [vmem:[#allocation18_spill] sm:$0xff] %v1135_v1  ;;  %v341_v35 = vmul.f32 %v1349_v11, %v1349_v11  ;;  %v602_v42 = vpop.eup %601  ;;  %627 = vpow2.f32 %v1025_v29  ;;  %v342_v4 = vmul.f32 %v1350_v34, %v1350_v34  ;;  %v343_v6 = vmul.f32 %v1351_v5, %v1351_v5  ;;  %v1352_v47 = vld [vmem:[#allocation34_spill] sm:$0xff]  ;;  %v1353_v23 = vld [vmem:[#allocation35_spill] sm:$0xff] }
  0x6a   :  { %1343 = vst [vmem:[#allocation47_spill] sm:$0xff] %v1137_v2  ;;  %1344 = vst [vmem:[#allocation19_spill] sm:$0xff] %v1140_v33  ;;  %v344_v43 = vmul.f32 %v1352_v47, %v1352_v47  ;;  %v604_v8 = vpop.eup %603  ;;  %629 = vpow2.f32 %v1028_v30  ;;  %v345_v32 = vmul.f32 %v1353_v23, %v1353_v23  ;;  %v346_v11 = vmul.f32 %v1354_v7, %v1354_v7  ;;  %v1356_v34 = vld [vmem:[#allocation38_spill] sm:$0xff]  ;;  %v1357_v33 = vld [vmem:[#allocation40_spill] sm:$0xff] }
  0x6b   :  { %1345 = vst [vmem:[#allocation48_spill] sm:$0xff] %v1142_v27  ;;  %1346 = vst [vmem:[#allocation20_spill] sm:$0xff] %v1144_v51  ;;  %v1355_v51 = vld [vmem:[#allocation37_spill] sm:$0xff]  ;;  %v606_v27 = vpop.eup %605  ;;  %631 = vpow2.f32 %v1031_v31  ;;  %v348_v5 = vmul.f32 %v1356_v34, %v1356_v34  ;;  %v349_v47 = vmul.f32 %v1357_v33, %v1357_v33  ;;  %v1359_v23 = vld [vmem:[#allocation44_spill] sm:$0xff]  ;;  %v359_v34 = vadd.f32 %v1049_v26, %v339_v22 }
  0x6c   :  { %v347_v29 = vmul.f32 %v1355_v51, %v1355_v51  ;;  %v1358_v2 = vld [vmem:[#allocation41_spill] sm:$0xff]  ;;  %v608_v1 = vpop.eup %607  ;;  %633 = vpow2.f32 %v1034_v36  ;;  %v351_v7 = vmul.f32 %v1359_v23, %v1359_v23  ;;  %v1361_v58 = vld [vmem:[#allocation51_spill] sm:$0xff]  ;;  %v360_v33 = vadd.f32 %v1057_v16, %v340_v20  ;;  %v1362_v36 = vld [vmem:[#allocation52_spill] sm:$0xff] }
  0x6d   :  { %v350_v30 = vmul.f32 %v1358_v2, %v1358_v2  ;;  %v1360_v41 = vld [vmem:[#allocation45_spill] sm:$0xff]  ;;  %v353_v31 = vmul.f32 %v1361_v58, %v1361_v58  ;;  %v610_v53 = vpop.eup %609  ;;  %v361_v9 = vadd.f32 %v1065_v50, %v341_v35  ;;  %v362_v2 = vadd.f32 %v1073_v12, %v342_v4  ;;  %v1366_v48 = vld [vmem:[#allocation58_spill] sm:$0xff] }
  0x6e   :  { %v352_v51 = vmul.f32 %v1360_v41, %v1360_v41  ;;  %v612_v49 = vpop.eup %611  ;;  %635 = vpow2.f32 %v1037_v37  ;;  %v354_v23 = vmul.f32 %v1362_v36, %v1362_v36  ;;  %v355_v41 = vmul.f32 %v1363_v44, %v1363_v44 }
  0x6f   :  { %v356_v58 = vmul.f32 %v1364_v60, %v1364_v60  ;;  %v614_v24 = vpop.eup %613  ;;  %637 = vpow2.f32 %v1040_v38  ;;  %v357_v26 = vmul.f32 %v993_v0, %v993_v0  ;;  %v363_v16 = vadd.f32 %v1081_v28, %v343_v6 }
  0x70   :  { %v364_v50 = vadd.f32 %v1089_v46, %v344_v43  ;;  %v616_v37 = vpop.eup %615  ;;  %639 = vpow2.f32 %v1043_v39  ;;  %v358_v12 = vmul.f32 %v998_v56, %v998_v56  ;;  %v365_v44 = vadd.f32 %v1097_v40, %v345_v32 }
  0x71   :  { %v366_v60 = vadd.f32 %v1105_v13, %v346_v11  ;;  %v618_v22 = vpop.eup %617  ;;  %v379_v20 = vmul.f32 0.5, %v359_v34  ;;  %v380_v38 = vmul.f32 0.5, %v360_v33  ;;  %v381_v35 = vmul.f32 0.5, %v361_v9 }
  0x72   :  { %v382_v4 = vmul.f32 0.5, %v362_v2  ;;  %v620_v0 = vpop.eup %619  ;;  %v367_v28 = vadd.f32 %v1113_v55, %v347_v29  ;;  %v368_v46 = vadd.f32 %v1121_v52, %v348_v5  ;;  %v369_v6 = vadd.f32 %v1130_v59, %v349_v47  ;;  %v1365_v2 = vld [vmem:[#allocation57_spill] sm:$0xff] }
  0x73   :  { %v370_v39 = vadd.f32 %v598_v57, %v350_v30  ;;  %v622_v43 = vpop.eup %621  ;;  %v371_v36 = vadd.f32 %v600_v3, %v351_v7  ;;  %v372_v56 = vadd.f32 %v602_v42, %v352_v51  ;;  %v383_v45 = vmul.f32 0.5, %v363_v16 }
  0x74   :  { %v384_v40 = vmul.f32 0.5, %v364_v50  ;;  %v624_v32 = vpop.eup %623  ;;  %v373_v13 = vadd.f32 %v604_v8, %v353_v31  ;;  %v374_v11 = vadd.f32 %v606_v27, %v354_v23  ;;  %v385_v34 = vmul.f32 0.5, %v365_v44 }
  0x75   :  { %v386_v33 = vmul.f32 0.5, %v366_v60  ;;  %v626_v9 = vpop.eup %625  ;;  %v399_v25 = vmul.f32 %v1365_v2, %v379_v20  ;;  %v400_v55 = vmul.f32 %v1366_v48, %v380_v38  ;;  %v401_v52 = vmul.f32 %v1000_v21, %v381_v35 }
  0x76   :  { %v402_v59 = vmul.f32 %v1002_v19, %v382_v4  ;;  %v628_v57 = vpop.eup %627  ;;  %v375_v29 = vadd.f32 %v608_v1, %v355_v41  ;;  %v376_v3 = vadd.f32 %v610_v53, %v356_v58  ;;  %v377_v42 = vadd.f32 %v612_v49, %v357_v26 }
  0x77   :  { %v378_v5 = vadd.f32 %v614_v24, %v358_v12  ;;  %v630_v47 = vpop.eup %629  ;;  %v387_v30 = vmul.f32 0.5, %v367_v28  ;;  %v388_v8 = vmul.f32 0.5, %v368_v46  ;;  %v403_v27 = vmul.f32 %v1004_v54, %v383_v45  ;;  %v1369_v46 = vld [vmem:[#allocation42_spill] sm:$0xff] }
  0x78   :  { %v404_v7 = vmul.f32 %v1006_v14, %v384_v40  ;;  %v632_v51 = vpop.eup %631  ;;  %v389_v31 = vmul.f32 0.5, %v369_v6  ;;  %v390_v23 = vmul.f32 0.5, %v370_v39  ;;  %v405_v48 = vmul.f32 %v1013_v18, %v385_v34  ;;  %v1370_v6 = vld [vmem:[#allocation16_spill] sm:$0xff] }
  0x79   :  { %v406_v21 = vmul.f32 %v616_v37, %v386_v33  ;;  %v634_v16 = vpop.eup %633  ;;  %v419_v19 = vadd.f32 %v1099_v61, %v399_v25  ;;  %v420_v53 = vadd.f32 %v1101_v63, %v400_v55  ;;  %v421_v49 = vadd.f32 %v1103_v17, %v401_v52  ;;  %v1367_v17 = vld [vmem:[#allocation39_spill] sm:$0xff] }
  0x7a   :  { %v422_v24 = vadd.f32 %v1107_v15, %v402_v59  ;;  %v391_v1 = vmul.f32 0.5, %v371_v36  ;;  %v392_v41 = vmul.f32 0.5, %v372_v56  ;;  %v393_v54 = vmul.f32 0.5, %v373_v13  ;;  %v1368_v15 = vld [vmem:[#allocation15_spill] sm:$0xff]  ;;  %v1374_v13 = vld [vmem:[#allocation28_spill] sm:$0xff] }
  0x7b   :  { %v394_v45 = vmul.f32 0.5, %v374_v11  ;;  %v636_v14 = vpop.eup %635  ;;  %v407_v58 = vmul.f32 %v618_v22, %v387_v30  ;;  %v408_v26 = vmul.f32 %v620_v0, %v388_v8  ;;  %v423_v50 = vadd.f32 %v1109_v10, %v403_v27  ;;  %v1371_v56 = vld [vmem:[#allocation27_spill] sm:$0xff]  ;;  %v1379_v27 = vld [vmem:[#allocation46_spill] sm:$0xff] }
  0x7c   :  { %v424_v18 = vadd.f32 %v1111_v62, %v404_v7  ;;  %v638_v37 = vpop.eup %637  ;;  %v395_v12 = vmul.f32 0.5, %v375_v29  ;;  %v396_v61 = vmul.f32 0.5, %v376_v3  ;;  %v409_v25 = vmul.f32 %v622_v43, %v389_v31  ;;  %v1372_v43 = vld [vmem:[#allocation54_spill] sm:$0xff]  ;;  %v1375_v11 = vld [vmem:[#allocation55_spill] sm:$0xff] }
  0x7d   :  { %v410_v63 = vmul.f32 %v624_v32, %v390_v23  ;;  %v640_v44 = vpop.eup %639  ;;  %v425_v60 = vadd.f32 %v1367_v17, %v405_v48  ;;  %v426_v20 = vadd.f32 %v1368_v15, %v406_v21  ;;  %v494_v38 = vadd.f32 %v421_v49, %v419_v19  ;;  %v1377_v52 = vld [vmem:[#allocation43_spill] sm:$0xff]  ;;  %v1380_v31 = vld [vmem:[#allocation18_spill] sm:$0xff] }
  0x7e   :  { %v503_v35 = vadd.f32 %v422_v24, %v420_v53  ;;  %v397_v4 = vmul.f32 0.5, %v377_v42  ;;  %v398_v28 = vmul.f32 0.5, %v378_v5  ;;  %v411_v22 = vmul.f32 %v626_v9, %v391_v1  ;;  %v1378_v9 = vld [vmem:[#allocation17_spill] sm:$0xff]  ;;  %v1381_v19 = vld [vmem:[#allocation47_spill] sm:$0xff] }
  0x7f   :  { %v412_v0 = vmul.f32 %v628_v57, %v392_v41  ;;  %v427_v10 = vadd.f32 %v1369_v46, %v407_v58  ;;  %v428_v62 = vadd.f32 %v1370_v6, %v408_v26  ;;  %v495_v39 = vadd.f32 %v494_v38, %v423_v50 }
  0x80   :  { %v504_v36 = vadd.f32 %v503_v35, %v424_v18  ;;  %v1373_v40 = vsub.f32 %v1371_v56, %v1372_v43  ;;  %v1376_v34 = vsub.f32 %v1374_v13, %v1375_v11  ;;  %v413_v2 = vmul.f32 %v630_v47, %v393_v54  ;;  %v1382_v47 = vld [vmem:[#allocation19_spill] sm:$0xff]  ;;  %v1383_v54 = vld [vmem:[#allocation22_spill] sm:$0xff] }
  0x81   :  { %v414_v55 = vmul.f32 %v632_v51, %v394_v45  ;;  %v429_v59 = vadd.f32 %v1377_v52, %v409_v25  ;;  %v430_v57 = vadd.f32 %v1378_v9, %v410_v63  ;;  %v496_v29 = vadd.f32 %v495_v39, %v425_v60 }
  0x82   :  { %v551_v32 = vadd.f32 -0.5, %v1373_v40  ;;  %v552_v33 = vadd.f32 -0.5, %v1376_v34  ;;  %v505_v3 = vadd.f32 %v504_v36, %v426_v20  ;;  %v415_v42 = vmul.f32 %v634_v16, %v395_v12  ;;  %v1384_v16 = vld [vmem:[#allocation48_spill] sm:$0xff] }
  0x83   :  { %v416_v5 = vmul.f32 %v636_v14, %v396_v61  ;;  %v417_v30 = vmul.f32 %v638_v37, %v397_v4  ;;  %v418_v8 = vmul.f32 %v640_v44, %v398_v28  ;;  %v431_v7 = vadd.f32 %v1379_v27, %v411_v22  ;;  %v1385_v14 = vld [vmem:[#allocation20_spill] sm:$0xff] }
  0x84   :  { %v432_v23 = vadd.f32 %v1380_v31, %v412_v0  ;;  %v497_v48 = vadd.f32 %v496_v29, %v427_v10  ;;  %v506_v21 = vadd.f32 %v505_v3, %v428_v62  ;;  %v433_v53 = vadd.f32 %v1381_v19, %v413_v2 }
  0x85   :  { %v434_v51 = vadd.f32 %v1382_v47, %v414_v55  ;;  %v437_v1 = vadd.f32 %v551_v32, %v417_v30  ;;  %v438_v41 = vadd.f32 %v552_v33, %v418_v8  ;;  %vm471_vm0 = vcmp.lt.s32.totalorder %v1383_v54, 75 }
  0x86   :  { %v498_v49 = vadd.f32 %v497_v48, %v429_v59  ;;  %v507_v24 = vadd.f32 %v506_v21, %v430_v57  ;;  %v435_v45 = vadd.f32 %v1384_v16, %v415_v42  ;;  %v436_v58 = vadd.f32 %v1385_v14, %v416_v5 }
  0x87   :  { %v490_v12 = vsel %vm471_vm0, %v437_v1, 0.0  ;;  %v491_v61 = vsel %vm471_vm0, %v438_v41, 0.0 }
  0x88   :  { %v499_v26 = vadd.f32 %v498_v49, %v431_v7  ;;  %v508_v50 = vadd.f32 %v507_v24, %v432_v23 }
  0x8a   :  { %v500_v18 = vadd.f32 %v499_v26, %v433_v53  ;;  %v509_v37 = vadd.f32 %v508_v50, %v434_v51 }
  0x8c   :  { %v501_v25 = vadd.f32 %v500_v18, %v435_v45  ;;  %v510_v63 = vadd.f32 %v509_v37, %v436_v58 }
  0x8e   :  { %v502_v44 = vadd.f32 %v501_v25, %v490_v12  ;;  %v511_v17 = vadd.f32 %v510_v63, %v491_v61 }
  0x90   :  { %514 = vst [vmem:[#allocation10] sm:$0xff] %v502_v44  ;;  %515 = vst [vmem:[#allocation10 + $0x8] sm:$0xff] %v511_v17 }
  0x91   :  { %732 = shalt.err (!%p729_p10)
}
  0x92   :  { %525 = dma.vmem_to_hbm [thread:$0]  %s523_s3, 256, %s1244_s4, [#allocation4]  }
  0x93   :  { %747 = dma.done.wait [#allocation4], 256  }
  0x94   :  { %748 = vsyncadd [#allocation4], 4294967040 }
  0x95   :  { %529 = vsyncpa [#allocation3], 1 }
  0x96   :  { %530 = vsyncpa [#allocation6], 1 }
  0x97   :  { %531 = vsyncpa [#allocation9], 1 }
  0x98   :  { %532 = vsyncpa [#allocation4], 1 }

</bundles_post_ra>
